<compile_context>
chip_gen: v7x
topology: tpu7x:2x2x1
jax: 0.10.0
libtpu: 0.0.40
codegen_flags: <defaults>
</compile_context>

<pallas_src>
import math
import jax
import jax.numpy as jnp
from jax.experimental import pallas as pl
from jax.experimental.pallas import tpu as pltpu


# ----------------------------- in-kernel math helpers -----------------------------
def _erf(x):
    # Abramowitz & Stegun 7.1.26 rational approximation, max abs error ~1.5e-7.
    a1, a2, a3, a4, a5 = 0.254829592, -0.284496736, 1.421413741, -1.453152027, 1.061405429
    p = 0.3275911
    ax = jnp.abs(x)
    t = 1.0 / (1.0 + p * ax)
    poly = t * (a1 + t * (a2 + t * (a3 + t * (a4 + t * a5))))
    y = 1.0 - poly * jnp.exp(-ax * ax)
    return jnp.where(x >= 0.0, y, -y)


def _gelu_exact(x):
    # Matches torch.nn.functional.gelu default (erf-based) semantics.
    return 0.5 * x * (1.0 + _erf(x * (1.0 / math.sqrt(2.0))))


# ----------------------------- kernel: dense + bias + GELU (full-K tile) -----------------------------
def intermediate_kernel(x_ref, w_ref, b_ref, o_ref):
    # x_ref: (tm, K) bf16 ; w_ref: (K, tn) bf16 ; b_ref: (1, tn) f32 ; o_ref: (tm, tn)
    z = jnp.dot(x_ref[...], w_ref[...], preferred_element_type=jnp.float32)
    z = z + b_ref[...]
    o_ref[...] = _gelu_exact(z).astype(o_ref.dtype)


# ----------------------------- tiling helpers -----------------------------
_VMEM_BUDGET = 24 * 1024 * 1024   # conservative: fits v7x (64 MiB physical / 32 MiB scoped)
_VMEM_LIMIT = 48 * 1024 * 1024    # raise scoped limit (v5e default is only 16 MiB)


def _round_up(x, m):
    return (x + m - 1) // m * m


def _vmem_estimate(tm, tn, K, x_bytes=2, w_bytes=2, o_bytes=4):
    # double-buffered input/output tiles
    return 2 * (tm * K * x_bytes + K * tn * w_bytes + tm * tn * o_bytes)


def _choose_tiles(M, N, K):
    tm_cands = [c for c in (512, 256, 128, 64, 32, 16) if c <= max(M, 16)] or [16]
    tn_cands = [c for c in (1536, 1024, 512, 256, 128) if c <= N and N % c == 0] + [N]
    for tm in tm_cands:
        for tn in tn_cands:
            if _vmem_estimate(tm, tn, K) <= _VMEM_BUDGET:
                return tm, tn
    return 16, N  # last-resort fallback (tiny shapes always fit the budget anyway)


# ----------------------------- wrapper -----------------------------
def layoutlmv2_intermediate(hidden_states, weight, bias):
    """hidden_states: (B, S, K) ; weight: (N, K) PyTorch nn.Linear layout ; bias: (N,)."""
    B, S, K = hidden_states.shape
    N = weight.shape[0]
    M = B * S
    out_dtype = hidden_states.dtype

    # One-time parameter prep. In production store the weight pre-transposed
    # (K, N) and pre-cast to bf16 at load time instead of doing this per call.
    w_t = jnp.asarray(weight, jnp.float32).T.astype(jnp.bfloat16)   # (K, N)
    b = jnp.asarray(bias, jnp.float32).reshape(1, N)                # keep bias in f32

    # Flatten (B, S) -> M, cast activations to bf16 for the MXU.
    x = hidden_states.reshape(M, K).astype(jnp.bfloat16)

    tm, tn = _choose_tiles(M, N, K)

    # Pad M up to a multiple of tm so every tile is lane/sublane-legal and no
    # giant full-extent fallback tile can blow VMEM.
    Mp = _round_up(max(M, tm), tm)
    if Mp != M:
        x = jnp.pad(x, ((0, Mp - M), (0, 0)))

    out = pl.pallas_call(
        intermediate_kernel,
        out_shape=jax.ShapeDtypeStruct((Mp, N), out_dtype),
        grid_spec=pltpu.PrefetchScalarGridSpec(
            num_scalar_prefetch=0,
            grid=(Mp // tm, N // tn),
            in_specs=[
                pl.BlockSpec((tm, K), lambda i, j: (i, 0)),   # activations, full K
                pl.BlockSpec((K, tn), lambda i, j: (0, j)),   # weight (K, N), full K
                pl.BlockSpec((1, tn), lambda i, j: (0, j)),   # bias row
            ],
            out_specs=pl.BlockSpec((tm, tn), lambda i, j: (i, j)),
        ),
        compiler_params=pltpu.CompilerParams(
            dimension_semantics=("parallel", "parallel"),
            vmem_limit_bytes=_VMEM_LIMIT,
        ),
    )(x, w_t, b)

    if Mp != M:
        out = out[:M]
    return out.reshape(B, S, N)


# ----------------------------- pure-JAX references (self-check) -----------------------------
def reference_bf16(hidden_states, weight, bias):
    # Same bf16 rounding of operands as the kernel, f32 math afterwards.
    x = hidden_states.astype(jnp.bfloat16).astype(jnp.float32)
    w = weight.astype(jnp.bfloat16).astype(jnp.float32)
    y = x @ w.T + bias
    return jax.nn.gelu(y, approximate=False)


def reference_f32(hidden_states, weight, bias):
    y = hidden_states @ weight.T + bias
    return jax.nn.gelu(y, approximate=False)


if __name__ == "__main__":
    B, S, hidden, intermediate = 2, 8, 32, 128

    key = jax.random.PRNGKey(0)
    k1, k2, k3 = jax.random.split(key, 3)

    hidden_states = jax.random.normal(k1, (B, S, hidden), jnp.float32)
    weight = 0.1 * jax.random.normal(k2, (intermediate, hidden), jnp.float32)  # (N, K)
    bias = 0.1 * jax.random.normal(k3, (intermediate,), jnp.float32)

    out = layoutlmv2_intermediate(hidden_states, weight, bias)
    out = jax.block_until_ready(out)

    ref_b = reference_bf16(hidden_states, weight, bias)
    ref_f = reference_f32(hidden_states, weight, bias)

    assert out.shape == (B, S, intermediate)
    # Tight check against a reference with identical bf16 operand rounding.
    assert jnp.allclose(out, ref_b, atol=1e-4, rtol=1e-4), float(jnp.max(jnp.abs(out - ref_b)))
    # Loose sanity check against full-f32 math (bf16 operand rounding dominates).
    assert jnp.allclose(out, ref_f, atol=5e-2, rtol=5e-2), float(jnp.max(jnp.abs(out - ref_f)))

    print("KERNEL_OK")
</pallas_src>

<mosaic_0001>
module attributes {stable_mosaic.version = 11 : i64} {
  func.func @intermediate_kernel(%arg0: i32, %arg1: i32, %arg2: memref<16x32xbf16, #tpu.memory_space<vmem>>, %arg3: memref<32x128xbf16, #tpu.memory_space<vmem>>, %arg4: memref<1x128xf32, #tpu.memory_space<vmem>>, %arg5: memref<16x128xf32, #tpu.memory_space<vmem>>) attributes {dimension_semantics = [#tpu.dimension_semantics<parallel>, #tpu.dimension_semantics<parallel>], iteration_bounds = array<i64: 1, 1>, scalar_prefetch = 0 : i64, scratch_operands = 0 : i64, tpu.core_type = #tpu.core_type<tc>, window_params = [{transform_indices = @transform_0, window_bounds = array<i64: 16, 32>}, {transform_indices = @transform_1, window_bounds = array<i64: 32, 128>}, {transform_indices = @transform_2, window_bounds = array<i64: 1, 128>}, {transform_indices = @transform_3, window_bounds = array<i64: 16, 128>}]} {
    %c0 = arith.constant 0 : index
    %c0_0 = arith.constant 0 : index
    %0 = vector.load %arg2[%c0, %c0_0] : memref<16x32xbf16, #tpu.memory_space<vmem>>, vector<16x32xbf16>
    %c0_1 = arith.constant 0 : index
    %c0_2 = arith.constant 0 : index
    %1 = vector.load %arg3[%c0_1, %c0_2] : memref<32x128xbf16, #tpu.memory_space<vmem>>, vector<32x128xbf16>
    %cst = arith.constant dense<0.000000e+00> : vector<16x128xf32>
    %2 = tpu.matmul %0, %1, %cst {dimension_numbers = #tpu.dot_dimension_numbers<[1], [0], [0], [1], [0, 0, 1, 1], [], []>} : vector<16x32xbf16>, vector<32x128xbf16>, vector<16x128xf32> -> vector<16x128xf32>
    %c0_3 = arith.constant 0 : index
    %c0_4 = arith.constant 0 : index
    %3 = vector.load %arg4[%c0_3, %c0_4] : memref<1x128xf32, #tpu.memory_space<vmem>>, vector<1x128xf32>
    %4 = vector.broadcast %3 : vector<1x128xf32> to vector<16x128xf32>
    %5 = arith.addf %2, %4 : vector<16x128xf32>
    %cst_5 = arith.constant 5.000000e-01 : f32
    %6 = vector.broadcast %cst_5 : f32 to vector<16x128xf32>
    %7 = arith.mulf %6, %5 : vector<16x128xf32>
    %cst_6 = arith.constant 0.707106769 : f32
    %8 = vector.broadcast %cst_6 : f32 to vector<16x128xf32>
    %9 = arith.mulf %5, %8 : vector<16x128xf32>
    %10 = math.absf %9 : vector<16x128xf32>
    %cst_7 = arith.constant 0.327591091 : f32
    %11 = vector.broadcast %cst_7 : f32 to vector<16x128xf32>
    %12 = arith.mulf %11, %10 : vector<16x128xf32>
    %cst_8 = arith.constant 1.000000e+00 : f32
    %13 = vector.broadcast %cst_8 : f32 to vector<16x128xf32>
    %14 = arith.addf %13, %12 : vector<16x128xf32>
    %cst_9 = arith.constant 1.000000e+00 : f32
    %15 = vector.broadcast %cst_9 : f32 to vector<16x128xf32>
    %16 = arith.divf %15, %14 : vector<16x128xf32>
    %cst_10 = arith.constant 1.06140542 : f32
    %17 = vector.broadcast %cst_10 : f32 to vector<16x128xf32>
    %18 = arith.mulf %16, %17 : vector<16x128xf32>
    %cst_11 = arith.constant -1.45315206 : f32
    %19 = vector.broadcast %cst_11 : f32 to vector<16x128xf32>
    %20 = arith.addf %19, %18 : vector<16x128xf32>
    %21 = arith.mulf %16, %20 : vector<16x128xf32>
    %cst_12 = arith.constant 1.42141378 : f32
    %22 = vector.broadcast %cst_12 : f32 to vector<16x128xf32>
    %23 = arith.addf %22, %21 : vector<16x128xf32>
    %24 = arith.mulf %16, %23 : vector<16x128xf32>
    %cst_13 = arith.constant -0.284496725 : f32
    %25 = vector.broadcast %cst_13 : f32 to vector<16x128xf32>
    %26 = arith.addf %25, %24 : vector<16x128xf32>
    %27 = arith.mulf %16, %26 : vector<16x128xf32>
    %cst_14 = arith.constant 0.254829586 : f32
    %28 = vector.broadcast %cst_14 : f32 to vector<16x128xf32>
    %29 = arith.addf %28, %27 : vector<16x128xf32>
    %30 = arith.mulf %16, %29 : vector<16x128xf32>
    %cst_15 = arith.constant 0.000000e+00 : f32
    %31 = vector.broadcast %cst_15 : f32 to vector<16x128xf32>
    %32 = arith.subf %31, %10 : vector<16x128xf32>
    %33 = arith.mulf %32, %10 : vector<16x128xf32>
    %34 = math.exp %33 : vector<16x128xf32>
    %35 = arith.mulf %30, %34 : vector<16x128xf32>
    %cst_16 = arith.constant 1.000000e+00 : f32
    %36 = vector.broadcast %cst_16 : f32 to vector<16x128xf32>
    %37 = arith.subf %36, %35 : vector<16x128xf32>
    %cst_17 = arith.constant 0.000000e+00 : f32
    %38 = vector.broadcast %cst_17 : f32 to vector<16x128xf32>
    %39 = arith.cmpf oge, %9, %38 : vector<16x128xf32>
    %cst_18 = arith.constant 0.000000e+00 : f32
    %40 = vector.broadcast %cst_18 : f32 to vector<16x128xf32>
    %41 = arith.subf %40, %37 : vector<16x128xf32>
    %42 = arith.select %39, %37, %41 : vector<16x128xi1>, vector<16x128xf32>
    %cst_19 = arith.constant 1.000000e+00 : f32
    %43 = vector.broadcast %cst_19 : f32 to vector<16x128xf32>
    %44 = arith.addf %43, %42 : vector<16x128xf32>
    %45 = arith.mulf %7, %44 : vector<16x128xf32>
    %c0_20 = arith.constant 0 : index
    %c0_21 = arith.constant 0 : index
    %46 = vector.load %arg5[%c0_20, %c0_21] : memref<16x128xf32, #tpu.memory_space<vmem>>, vector<16x128xf32>
    tpu.vector_store %arg5[%c0_20, %c0_21], %45 {strides = array<i32>} : memref<16x128xf32, #tpu.memory_space<vmem>>, vector<16x128xf32>,
    return
  }
  func.func @transform_0(%arg0: i32, %arg1: i32) -> (i32, i32) {
    %c0_i32 = arith.constant 0 : i32
    %c0_i32_0 = arith.constant 0 : i32
    return %arg0, %c0_i32 : i32, i32
  }
  func.func @transform_1(%arg0: i32, %arg1: i32) -> (i32, i32) {
    %c0_i32 = arith.constant 0 : i32
    %c0_i32_0 = arith.constant 0 : i32
    return %c0_i32, %arg1 : i32, i32
  }
  func.func @transform_2(%arg0: i32, %arg1: i32) -> (i32, i32) {
    %c0_i32 = arith.constant 0 : i32
    %c0_i32_0 = arith.constant 0 : i32
    return %c0_i32, %arg1 : i32, i32
  }
  func.func @transform_3(%arg0: i32, %arg1: i32) -> (i32, i32) {
    %c0_i32 = arith.constant 0 : i32
    return %arg0, %arg1 : i32, i32
  }
}

</mosaic_0001>

<bundles_post_ra>
// kernel: tpu_custom_call.1
= control target key start
LH: loop header
LB: loop body
LE: loop exit
PB: predicated region body
PF: predicated region fallthrough
CT: control target
= control target key end

     0   :  { %8 = vsyncpa [#allocation3], 0  ;;  %s369_s0 = inlined_call_operand.hbm [shape: bf16[16,32], index: 0, kind: input, shape index: {}]   ;;  %s370_s1 = inlined_call_operand.hbm [shape: bf16[32,128], index: 1, kind: input, shape index: {}]   ;;  %s371_s2 = inlined_call_operand.vmem [shape: f32[1,128], index: 2, kind: input, shape index: {}]   ;;  %s372_s3 = inlined_call_operand.hbm [shape: f32[16,128], index: 3, kind: output, shape index: {}]  }
   0x1   :  { %9 = vsyncpa [#allocation6], 0 }
   0x2   :  { %10 = vsyncpa [#allocation4], 0  ;;  %s301_s12 = smov [#allocation2]   ;;  %s229_s16 = scalar_lea.hbm %s369_s0, 128 }
   0x3   :  { %s16_s13 = sshll.u32 %s301_s12, 4  ;;  %p230_p0 = scmp.ne.s32.totalorder %s369_s0, %s229_s16  ;;  %s17_s13 = int_to_ptr.vmem [resolvable:$true] %s16_s13 }
   0x4   :  { %p233_p1 = scmp.lt.u32.totalorder %s229_s16, %s369_s0 }
   0x6   :  { %p235_p2 = pnand %p233_p1, %p230_p0 }
   0x8   :  { %238 = shalt.err (!%p235_p2)
}
   0x9   :  { %s239_s21 = scalar_lea.vmem %s17_s13, 128  ;;  %p244_p4 = scmp.lt.s32.totalorder %s17_s13, %s17_s13 }
   0xa   :  { %p240_p3 = scmp.ne.s32.totalorder %s17_s13, %s239_s21  ;;  %p245_p5 = scmp.lt.s32.totalorder %s239_s21, %s239_s21 }
   0xc   :  { %p246_p6 = por %p245_p5, %p244_p4 }
   0xe   :  { %p247_p7 = pnand %p246_p6, %p240_p3 }
  0x10   :  { %250 = shalt.err (!%p247_p7)
}
  0x11   :  { %s302_s22 = smov 64   ;;  %s303_s23 = smov 4  }
  0x12   :  { %22 = dma.hbm_to_vmem [thread:$0]  %s369_s0, 128, %s17_s13, [#allocation3], %s302_s22, %s302_s22, %s303_s23  }
  0x13   :  { %s304_s26 = smov [#allocation5]   ;;  %s251_s30 = scalar_lea.hbm %s370_s1, 256 }
  0x14   :  { %s28_s27 = sshll.u32 %s304_s26, 4  ;;  %p252_p8 = scmp.ne.s32.totalorder %s370_s1, %s251_s30  ;;  %s29_s27 = int_to_ptr.vmem [resolvable:$true] %s28_s27 }
  0x15   :  { %p255_p9 = scmp.lt.u32.totalorder %s251_s30, %s370_s1 }
  0x17   :  { %p257_p10 = pnand %p255_p9, %p252_p8 }
  0x19   :  { %260 = shalt.err (!%p257_p10)
}
  0x1a   :  { %s261_s8 = scalar_lea.vmem %s29_s27, 256  ;;  %p266_p12 = scmp.lt.s32.totalorder %s29_s27, %s29_s27 }
  0x1b   :  { %p262_p11 = scmp.ne.s32.totalorder %s29_s27, %s261_s8  ;;  %p267_p13 = scmp.lt.s32.totalorder %s261_s8, %s261_s8 }
  0x1d   :  { %p268_p0 = por %p267_p13, %p266_p12 }
  0x1f   :  { %p269_p1 = pnand %p268_p0, %p262_p11 }
  0x21   :  { %272 = shalt.err (!%p269_p1)
}
  0x22   :  { %34 = dma.hbm_to_vmem [thread:$0]  %s370_s1, 256, %s29_s27, [#allocation6], %s302_s22, %s302_s22, %s303_s23  }
  0x23   :  { %295 = dma.done.wait [#allocation3], 128  }
  0x24   :  { %296 = vsyncadd [#allocation3], 4294967168 }
  0x25   :  { %297 = dma.done.wait [#allocation6], 256  }
  0x26   :  { %298 = vsyncadd [#allocation6], 4294967040  ;;  %v305_v0 = vmov 0.0   ;;  %vm306_vm0 = vmmov 0   ;;  %v218_v1 = vld [vmem:[#allocation5] sm:$0xff]   ;;  %v219_v2 = vld [vmem:[#allocation5 + $0x8] sm:$0xff]  }
  0x27   :  { %201 = vmatprep.subr.bf16.mxu0 %v305_v0  ;;  %205 = vmatprep.mubr.msk.bf16.mxu0 %vm306_vm0, %v305_v0  ;;  %v220_v3 = vld [vmem:[#allocation2] sm:$0xff]   ;;  %vm74_vm1 = vcmask 261120   ;;  %s307_s1 = smov [#allocation7]  }
  0x28   :  { %202 = vmatpush3.bf16.msra.mxu0 %v218_v1  ;;  %v193_v4 = vld [vmem:[%s371_s2] ss:$0 sm:$0xff]  ;;  %s180_s2 = sshll.u32 %s307_s1, 4  ;;  %s181_s2 = int_to_ptr.vmem [resolvable:$true] %s180_s2 }
  0x29   :  { %203 = vmatprep.subr.bf16.mxu0 %v305_v0  ;;  %s273_s12 = scalar_lea.vmem %s181_s2, 256  ;;  %p278_p3 = scmp.lt.s32.totalorder %s181_s2, %s181_s2 }
  0x2a   :  { %p274_p2 = scmp.ne.s32.totalorder %s181_s2, %s273_s12  ;;  %p279_p4 = scmp.lt.s32.totalorder %s273_s12, %s273_s12 }
  0x2c   :  { %204 = vmatpush3.bf16.msra.mxu0 %v219_v2  ;;  %p280_p5 = por %p279_p4, %p278_p3 }
  0x2e   :  { %p281_p6 = pnand %p280_p5, %p274_p2 }
  0x2f   :  { %206 = vmatmul.mubr.msk.bf16.vlgmr.msra.gmra.mrb[0].mxu0 %vm74_vm1, %v220_v3 }
 0x102   :  { %v112_v5 = vpop.f32.mrb[0].mxu0 }
 0x103   :  { %v113_v6 = vadd.f32 %v193_v4, %v112_v5  ;;  %v207_v7 = vpop.f32.mrb[1].mxu0 }
 0x104   :  { %v115_v8 = vpop.f32.mrb[2].mxu0 }
 0x105   :  { %v121_v9 = vmul.f32 0.70710677, %v113_v6  ;;  %v116_v10 = vadd.f32 %v193_v4, %v115_v8  ;;  %v208_v11 = vpop.f32.mrb[3].mxu0  ;;  %v119_v53 = vmul.f32 0.5, %v113_v6 }
 0x107   :  { %v123_v12 = vand.u32 2147483647, %v121_v9  ;;  %v122_v13 = vmul.f32 0.70710677, %v116_v10  ;;  %vm163_vm2 = vcmp.ge.f32.partialorder %v121_v9, 0.0  ;;  %v120_v58 = vmul.f32 0.5, %v116_v10 }
 0x109   :  { %v125_v14 = vmul.f32 0.3275911, %v123_v12  ;;  %v124_v15 = vand.u32 2147483647, %v122_v13  ;;  %v151_v19 = vsub.f32 0.0, %v123_v12  ;;  %vm164_vm3 = vcmp.ge.f32.partialorder %v122_v13, 0.0 }
 0x10b   :  { %v127_v16 = vadd.f32 1.0, %v125_v14  ;;  %v126_v17 = vmul.f32 0.3275911, %v124_v15  ;;  %v152_v20 = vsub.f32 0.0, %v124_v15  ;;  %v153_v22 = vmul.f32 %v151_v19, %v123_v12 }
 0x10d   :  { %221 = vrcp.f32 %v127_v16  ;;  %v128_v18 = vadd.f32 1.0, %v126_v17  ;;  %v154_v26 = vmul.f32 %v152_v20, %v124_v15  ;;  %v155_v27 = vmul.f32 1.442695, %v153_v22 }
 0x10f   :  { %223 = vrcp.f32 %v128_v18  ;;  %v157_v32 = vmul.f32 1.442695, %v154_v26 }
 0x110   :  { %225 = vpow2.f32 %v155_v27 }
 0x111   :  { %227 = vpow2.f32 %v157_v32 }
 0x117   :  { %v222_v21 = vpop.eup %221 }
 0x118   :  { %v133_v23 = vmul.f32 1.0614054, %v222_v21 }
 0x119   :  { %v224_v24 = vpop.eup %223 }
 0x11a   :  { %v135_v25 = vadd.f32 -1.4531521, %v133_v23  ;;  %v134_v28 = vmul.f32 1.0614054, %v224_v24  ;;  %v226_v43 = vpop.eup %225 }
 0x11b   :  { %v228_v47 = vpop.eup %227 }
 0x11c   :  { %v137_v29 = vmul.f32 %v222_v21, %v135_v25  ;;  %v136_v30 = vadd.f32 -1.4531521, %v134_v28 }
 0x11e   :  { %v139_v31 = vadd.f32 1.4214138, %v137_v29  ;;  %v138_v33 = vmul.f32 %v224_v24, %v136_v30 }
 0x120   :  { %v141_v34 = vmul.f32 %v222_v21, %v139_v31  ;;  %v140_v35 = vadd.f32 1.4214138, %v138_v33 }
 0x122   :  { %v143_v36 = vadd.f32 -0.28449672, %v141_v34  ;;  %v142_v37 = vmul.f32 %v224_v24, %v140_v35 }
 0x124   :  { %v145_v38 = vmul.f32 %v222_v21, %v143_v36  ;;  %v144_v39 = vadd.f32 -0.28449672, %v142_v37 }
 0x126   :  { %v147_v40 = vadd.f32 0.2548296, %v145_v38  ;;  %v146_v41 = vmul.f32 %v224_v24, %v144_v39 }
 0x128   :  { %v149_v42 = vmul.f32 %v222_v21, %v147_v40  ;;  %v148_v44 = vadd.f32 0.2548296, %v146_v41 }
 0x12a   :  { %v159_v45 = vmul.f32 %v226_v43, %v149_v42  ;;  %v150_v46 = vmul.f32 %v224_v24, %v148_v44 }
 0x12c   :  { %v161_v48 = vsub.f32 1.0, %v159_v45  ;;  %v160_v49 = vmul.f32 %v228_v47, %v150_v46 }
 0x12e   :  { %v165_v50 = vsub.f32 0.0, %v161_v48  ;;  %v162_v51 = vsub.f32 1.0, %v160_v49 }
 0x130   :  { %v167_v52 = vsel %vm163_vm2, %v161_v48, %v165_v50  ;;  %v166_v55 = vsub.f32 0.0, %v162_v51 }
 0x131   :  { %v169_v54 = vadd.f32 1.0, %v167_v52 }
 0x132   :  { %v168_v57 = vsel %vm164_vm3, %v162_v51, %v166_v55 }
 0x133   :  { %v171_v56 = vmul.f32 %v169_v54, %v119_v53  ;;  %v170_v59 = vadd.f32 1.0, %v168_v57 }
 0x135   :  { %173 = vst [vmem:[#allocation7] sm:$0xff] %v171_v56  ;;  %v172_v60 = vmul.f32 %v170_v59, %v120_v58 }
 0x137   :  { %174 = vst [vmem:[#allocation7 + $0x8] sm:$0xff] %v172_v60 }
 0x138   :  { %284 = shalt.err (!%p281_p6)
}
 0x139   :  { %s285_s15 = scalar_lea.hbm %s372_s3, 256 }
 0x13a   :  { %p286_p7 = scmp.ne.s32.totalorder %s372_s3, %s285_s15  ;;  %p289_p8 = scmp.lt.u32.totalorder %s285_s15, %s372_s3 }
 0x13c   :  { %p291_p9 = pnand %p289_p8, %p286_p7 }
 0x13e   :  { %294 = shalt.err (!%p291_p9)
}
 0x13f   :  { %s308_s20 = smov 128   ;;  %s309_s21 = smov 8  }
 0x140   :  { %186 = dma.vmem_to_hbm [thread:$0]  %s181_s2, 256, %s372_s3, [#allocation4], %s308_s20, %s308_s20, %s309_s21  }
 0x141   :  { %299 = dma.done.wait [#allocation4], 256  }
 0x142   :  { %300 = vsyncadd [#allocation4], 4294967040 }
 0x143   :  { %190 = vsyncpa [#allocation3], 1 }
 0x144   :  { %191 = vsyncpa [#allocation6], 1 }
 0x145   :  { %192 = vsyncpa [#allocation4], 1 }

</bundles_post_ra>
